<compile_context>
chip_gen: v5e
topology: v5e:2x2
jax: 0.10.0
libtpu: 0.0.40
codegen_flags: <defaults>
</compile_context>

<pallas_src>
import numpy as np
import jax
import jax.numpy as jnp
from jax.experimental import pallas as pl
from jax.experimental.pallas import tpu as pltpu


# ----------------------------------------------------------------------------
# Seasonality-basis construction (mirrors the PyTorch SeasonalityBasis __init__).
# ----------------------------------------------------------------------------
def make_seasonality_basis(harmonics: int, backcast_size: int, forecast_size: int):
    frequency = np.append(
        np.zeros(1, dtype=np.float32),
        np.arange(harmonics, harmonics / 2 * forecast_size, dtype=np.float32) / harmonics,
    )[None, :]
    backcast_grid = (
        -2 * np.pi * (np.arange(backcast_size, dtype=np.float32)[:, None] / forecast_size)
        * frequency)
    forecast_grid = (
        2 * np.pi * (np.arange(forecast_size, dtype=np.float32)[:, None] / forecast_size)
        * frequency)
    backcast_cos = np.transpose(np.cos(backcast_grid)).astype(np.float32)
    backcast_sin = np.transpose(np.sin(backcast_grid)).astype(np.float32)
    backcast_template = np.concatenate([backcast_cos, backcast_sin], axis=0)   # [P, Tb]
    forecast_cos = np.transpose(np.cos(forecast_grid)).astype(np.float32)
    forecast_sin = np.transpose(np.sin(forecast_grid)).astype(np.float32)
    forecast_template = np.concatenate([forecast_cos, forecast_sin], axis=0)   # [P, Tf]
    return backcast_template, forecast_template                                 # numpy f32


def fold_output_layer_into_basis(w_out, b_out, backcast_basis, forecast_basis):
    """Fold the final nn.Linear into the basis projection (done in float64).

    theta layout (as in the PyTorch block): theta[:, :P] -> forecast half,
    theta[:, P:2P] -> backcast half.
    Returns (w_back [H,Tb], b_back [1,Tb], w_fore [H,Tf], b_fore [1,Tf]) in f32.
    """
    P = backcast_basis.shape[0]
    w64 = np.asarray(w_out, np.float64)
    b64 = np.asarray(b_out, np.float64)
    bb = np.asarray(backcast_basis, np.float64)
    fb = np.asarray(forecast_basis, np.float64)
    w_back = (w64[:, P:2 * P] @ bb).astype(np.float32)
    b_back = (b64[:, P:2 * P] @ bb).astype(np.float32)
    w_fore = (w64[:, :P] @ fb).astype(np.float32)
    b_fore = (b64[:, :P] @ fb).astype(np.float32)
    return (jnp.asarray(w_back), jnp.asarray(b_back),
            jnp.asarray(w_fore), jnp.asarray(b_fore))


# ----------------------------------------------------------------------------
# Fused NBeatsBlock kernel: FC stack + (output layer folded into basis).
# ----------------------------------------------------------------------------
def _make_nbeats_kernel(n_hidden_layers: int):
    def kernel(*refs):
        x_ref = refs[0]
        back_ref, fore_ref = refs[-2], refs[-1]
        params = refs[1:-2]   # W1, b1, ..., WL, bL, W_back, b_back, W_fore, b_fore

        h = x_ref[...]
        for i in range(n_hidden_layers):                         # Linear + ReLU stack
            w = params[2 * i][...]
            b = params[2 * i + 1][...]
            h = jnp.maximum(
                jnp.dot(h, w, preferred_element_type=jnp.float32) + b, 0.0)

        w_back, b_back, w_fore, b_fore = (p[...] for p in params[2 * n_hidden_layers:])
        # Output layer fused with the basis at init -> two real-width outputs;
        # theta never materializes and nothing padded is written to HBM.
        back_ref[...] = jnp.dot(h, w_back, preferred_element_type=jnp.float32) + b_back
        fore_ref[...] = jnp.dot(h, w_fore, preferred_element_type=jnp.float32) + b_fore
    return kernel


def _pick_batch_tile(batch: int, requested: int) -> int:
    """Whole batch if it fits in one tile; otherwise a multiple of 8 that fills
    >=256 MXU rows while keeping roughly >=8 grid steps (v7x has 2 TensorCores
    and the batch axis is the only parallel axis)."""
    if batch <= requested:
        return batch
    tile = min(requested, max(256, -(-batch // 8)))
    return max(8, (tile // 8) * 8)


def nbeats_block_forward(x, hidden_weights, hidden_biases,
                         w_back, b_back, w_fore, b_fore,
                         *, batch_tile: int = 512):
    """x: [B, x_t_n_inputs] f32  ->  (backcast [B, Tb], forecast [B, Tf])."""
    B, d_in = x.shape
    n_hidden = len(hidden_weights)
    tb = _pick_batch_tile(B, batch_tile)
    t_back = w_back.shape[1]
    t_fore = w_fore.shape[1]

    const2d = lambda a: pl.BlockSpec(a.shape, lambda i: (0, 0))   # VMEM-resident params

    in_specs = [pl.BlockSpec((tb, d_in), lambda i: (i, 0))]
    args = [x]
    for w, b in zip(hidden_weights, hidden_biases):
        in_specs += [const2d(w), const2d(b)]
        args += [w, b]
    for p in (w_back, b_back, w_fore, b_fore):
        in_specs.append(const2d(p))
        args.append(p)

    backcast, forecast = pl.pallas_call(
        _make_nbeats_kernel(n_hidden),
        out_shape=(jax.ShapeDtypeStruct((B, t_back), jnp.float32),
                   jax.ShapeDtypeStruct((B, t_fore), jnp.float32)),
        grid=(pl.cdiv(B, tb),),
        in_specs=in_specs,
        out_specs=(pl.BlockSpec((tb, t_back), lambda i: (i, 0)),
                   pl.BlockSpec((tb, t_fore), lambda i: (i, 0))),
        compiler_params=pltpu.CompilerParams(
            dimension_semantics=("parallel",)),
    )(*args)
    return backcast, forecast


# ----------------------------------------------------------------------------
# Parameter init (stand-in for the PyTorch nn.Linear parameters).
# ----------------------------------------------------------------------------
def init_params(key, layer_dims, theta_n_dim):
    """layer_dims = [x_t_n_inputs, h1, ..., hL].  Returns hidden (weights,
    biases) plus the un-fused output layer (w_out [hL, theta_n_dim], b_out)."""
    n_hidden = len(layer_dims) - 1
    keys = jax.random.split(key, 2 * (n_hidden + 1))
    weights, biases = [], []
    for i in range(n_hidden):
        fan_in = layer_dims[i]
        w = jax.random.normal(keys[2 * i], (layer_dims[i], layer_dims[i + 1]),
                              jnp.float32) / np.sqrt(fan_in)
        b = 0.1 * jax.random.normal(keys[2 * i + 1], (1, layer_dims[i + 1]), jnp.float32)
        weights.append(w)
        biases.append(b)
    fan_in = layer_dims[-1]
    w_out = jax.random.normal(keys[-2], (layer_dims[-1], theta_n_dim),
                              jnp.float32) / np.sqrt(fan_in)
    b_out = 0.1 * jax.random.normal(keys[-1], (1, theta_n_dim), jnp.float32)
    return weights, biases, w_out, b_out


if __name__ == "__main__":
    # Small eval config consistent with the module: insample length 16, two
    # hidden layers of 32, ReLU, seasonality basis (harmonics=2, forecast=8),
    # batch_normalization=False, dropout_prob=0.
    harmonics = 2
    backcast_size = 16          # x_t_n_inputs
    forecast_size = 8
    theta_n_hidden = [32, 32]   # n_layers = 2

    back_basis_np, fore_basis_np = make_seasonality_basis(
        harmonics, backcast_size, forecast_size)
    P = fore_basis_np.shape[0]
    theta_n_dim = 2 * P         # 28

    key = jax.random.PRNGKey(0)
    k_x, k_p = jax.random.split(key)
    weights, biases, w_out, b_out = init_params(
        k_p, [backcast_size] + theta_n_hidden, theta_n_dim)
    w_back, b_back, w_fore, b_fore = fold_output_layer_into_basis(
        w_out, b_out, back_basis_np, fore_basis_np)

    def reference(xr):
        # Pure-JAX reference with the PyTorch forward's op order (theta, then basis).
        hp = jax.lax.Precision.HIGHEST
        h = xr
        for w, b in zip(weights, biases):
            h = jnp.maximum(jnp.dot(h, w, precision=hp) + b, 0.0)
        theta = jnp.dot(h, w_out, precision=hp) + b_out
        back = jnp.einsum("bp,pt->bt", theta[:, P:], jnp.asarray(back_basis_np), precision=hp)
        fore = jnp.einsum("bp,pt->bt", theta[:, :P], jnp.asarray(fore_basis_np), precision=hp)
        return back, fore

    # 1) small example: whole batch in a single tile
    batch = 16
    x = jax.random.normal(k_x, (batch, backcast_size), dtype=jnp.float32)
    backcast, forecast = nbeats_block_forward(
        x, weights, biases, w_back, b_back, w_fore, b_fore)
    jax.block_until_ready((backcast, forecast))
    assert backcast.shape == (batch, backcast_size)
    assert forecast.shape == (batch, forecast_size)
    back_ref, fore_ref = reference(x)
    np.testing.assert_allclose(np.asarray(backcast), np.asarray(back_ref), rtol=1e-4, atol=1e-4)
    np.testing.assert_allclose(np.asarray(forecast), np.asarray(fore_ref), rtol=1e-4, atol=1e-4)

    # 2) non-multiple batch with a multi-step grid (exercises the partial tile)
    batch2 = 20
    x2 = jax.random.normal(jax.random.PRNGKey(1), (batch2, backcast_size), dtype=jnp.float32)
    backcast2, forecast2 = nbeats_block_forward(
        x2, weights, biases, w_back, b_back, w_fore, b_fore, batch_tile=8)
    jax.block_until_ready((backcast2, forecast2))
    back_ref2, fore_ref2 = reference(x2)
    np.testing.assert_allclose(np.asarray(backcast2), np.asarray(back_ref2), rtol=1e-4, atol=1e-4)
    np.testing.assert_allclose(np.asarray(forecast2), np.asarray(fore_ref2), rtol=1e-4, atol=1e-4)

    print("KERNEL_OK")
</pallas_src>

<mosaic_0001>
module attributes {stable_mosaic.version = 11 : i64} {
  func.func @kernel(%arg0: i32, %arg1: memref<16x16xf32, #tpu.memory_space<vmem>>, %arg2: memref<16x32xf32, #tpu.memory_space<vmem>>, %arg3: memref<1x32xf32, #tpu.memory_space<vmem>>, %arg4: memref<32x32xf32, #tpu.memory_space<vmem>>, %arg5: memref<1x32xf32, #tpu.memory_space<vmem>>, %arg6: memref<32x16xf32, #tpu.memory_space<vmem>>, %arg7: memref<1x16xf32, #tpu.memory_space<vmem>>, %arg8: memref<32x8xf32, #tpu.memory_space<vmem>>, %arg9: memref<1x8xf32, #tpu.memory_space<vmem>>, %arg10: memref<16x16xf32, #tpu.memory_space<vmem>>, %arg11: memref<16x8xf32, #tpu.memory_space<vmem>>) attributes {dimension_semantics = [#tpu.dimension_semantics<parallel>], iteration_bounds = array<i64: 1>, scalar_prefetch = 0 : i64, scratch_operands = 0 : i64, tpu.core_type = #tpu.core_type<tc>, window_params = [{transform_indices = @transform_0, window_bounds = array<i64: 16, 16>}, {pipeline_mode = #tpu.pipeline_mode<synchronous>, transform_indices = @transform_1, window_bounds = array<i64: 16, 32>}, {pipeline_mode = #tpu.pipeline_mode<synchronous>, transform_indices = @transform_2, window_bounds = array<i64: 1, 32>}, {pipeline_mode = #tpu.pipeline_mode<synchronous>, transform_indices = @transform_3, window_bounds = array<i64: 32, 32>}, {pipeline_mode = #tpu.pipeline_mode<synchronous>, transform_indices = @transform_4, window_bounds = array<i64: 1, 32>}, {pipeline_mode = #tpu.pipeline_mode<synchronous>, transform_indices = @transform_5, window_bounds = array<i64: 32, 16>}, {pipeline_mode = #tpu.pipeline_mode<synchronous>, transform_indices = @transform_6, window_bounds = array<i64: 1, 16>}, {pipeline_mode = #tpu.pipeline_mode<synchronous>, transform_indices = @transform_7, window_bounds = array<i64: 32, 8>}, {pipeline_mode = #tpu.pipeline_mode<synchronous>, transform_indices = @transform_8, window_bounds = array<i64: 1, 8>}, {transform_indices = @transform_9, window_bounds = array<i64: 16, 16>}, {transform_indices = @transform_10, window_bounds = array<i64: 16, 8>}]} {
    %c0 = arith.constant 0 : index
    %c0_0 = arith.constant 0 : index
    %0 = vector.load %arg1[%c0, %c0_0] : memref<16x16xf32, #tpu.memory_space<vmem>>, vector<16x16xf32>
    %c0_1 = arith.constant 0 : index
    %c0_2 = arith.constant 0 : index
    %1 = vector.load %arg2[%c0_1, %c0_2] : memref<16x32xf32, #tpu.memory_space<vmem>>, vector<16x32xf32>
    %c0_3 = arith.constant 0 : index
    %c0_4 = arith.constant 0 : index
    %2 = vector.load %arg3[%c0_3, %c0_4] : memref<1x32xf32, #tpu.memory_space<vmem>>, vector<1x32xf32>
    %cst = arith.constant dense<0.000000e+00> : vector<16x32xf32>
    %3 = tpu.matmul %0, %1, %cst {dimension_numbers = #tpu.dot_dimension_numbers<[1], [0], [0], [1], [0, 0, 1, 1], [], []>} : vector<16x16xf32>, vector<16x32xf32>, vector<16x32xf32> -> vector<16x32xf32>
    %4 = vector.broadcast %2 : vector<1x32xf32> to vector<16x32xf32>
    %5 = arith.addf %3, %4 : vector<16x32xf32>
    %cst_5 = arith.constant 0.000000e+00 : f32
    %6 = vector.broadcast %cst_5 : f32 to vector<16x32xf32>
    %7 = arith.maximumf %5, %6 : vector<16x32xf32>
    %c0_6 = arith.constant 0 : index
    %c0_7 = arith.constant 0 : index
    %8 = vector.load %arg4[%c0_6, %c0_7] : memref<32x32xf32, #tpu.memory_space<vmem>>, vector<32x32xf32>
    %c0_8 = arith.constant 0 : index
    %c0_9 = arith.constant 0 : index
    %9 = vector.load %arg5[%c0_8, %c0_9] : memref<1x32xf32, #tpu.memory_space<vmem>>, vector<1x32xf32>
    %cst_10 = arith.constant dense<0.000000e+00> : vector<16x32xf32>
    %10 = tpu.matmul %7, %8, %cst_10 {dimension_numbers = #tpu.dot_dimension_numbers<[1], [0], [0], [1], [0, 0, 1, 1], [], []>} : vector<16x32xf32>, vector<32x32xf32>, vector<16x32xf32> -> vector<16x32xf32>
    %11 = vector.broadcast %9 : vector<1x32xf32> to vector<16x32xf32>
    %12 = arith.addf %10, %11 : vector<16x32xf32>
    %cst_11 = arith.constant 0.000000e+00 : f32
    %13 = vector.broadcast %cst_11 : f32 to vector<16x32xf32>
    %14 = arith.maximumf %12, %13 : vector<16x32xf32>
    %c0_12 = arith.constant 0 : index
    %c0_13 = arith.constant 0 : index
    %15 = vector.load %arg6[%c0_12, %c0_13] : memref<32x16xf32, #tpu.memory_space<vmem>>, vector<32x16xf32>
    %c0_14 = arith.constant 0 : index
    %c0_15 = arith.constant 0 : index
    %16 = vector.load %arg7[%c0_14, %c0_15] : memref<1x16xf32, #tpu.memory_space<vmem>>, vector<1x16xf32>
    %c0_16 = arith.constant 0 : index
    %c0_17 = arith.constant 0 : index
    %17 = vector.load %arg8[%c0_16, %c0_17] : memref<32x8xf32, #tpu.memory_space<vmem>>, vector<32x8xf32>
    %c0_18 = arith.constant 0 : index
    %c0_19 = arith.constant 0 : index
    %18 = vector.load %arg9[%c0_18, %c0_19] : memref<1x8xf32, #tpu.memory_space<vmem>>, vector<1x8xf32>
    %cst_20 = arith.constant dense<0.000000e+00> : vector<16x16xf32>
    %19 = tpu.matmul %14, %15, %cst_20 {dimension_numbers = #tpu.dot_dimension_numbers<[1], [0], [0], [1], [0, 0, 1, 1], [], []>} : vector<16x32xf32>, vector<32x16xf32>, vector<16x16xf32> -> vector<16x16xf32>
    %20 = vector.broadcast %16 : vector<1x16xf32> to vector<16x16xf32>
    %21 = arith.addf %19, %20 : vector<16x16xf32>
    %c0_21 = arith.constant 0 : index
    %c0_22 = arith.constant 0 : index
    %22 = vector.load %arg10[%c0_21, %c0_22] : memref<16x16xf32, #tpu.memory_space<vmem>>, vector<16x16xf32>
    tpu.vector_store %arg10[%c0_21, %c0_22], %21 {strides = array<i32>} : memref<16x16xf32, #tpu.memory_space<vmem>>, vector<16x16xf32>,
    %cst_23 = arith.constant dense<0.000000e+00> : vector<16x8xf32>
    %23 = tpu.matmul %14, %17, %cst_23 {dimension_numbers = #tpu.dot_dimension_numbers<[1], [0], [0], [1], [0, 0, 1, 1], [], []>} : vector<16x32xf32>, vector<32x8xf32>, vector<16x8xf32> -> vector<16x8xf32>
    %24 = vector.broadcast %18 : vector<1x8xf32> to vector<16x8xf32>
    %25 = arith.addf %23, %24 : vector<16x8xf32>
    %c0_24 = arith.constant 0 : index
    %c0_25 = arith.constant 0 : index
    %26 = vector.load %arg11[%c0_24, %c0_25] : memref<16x8xf32, #tpu.memory_space<vmem>>, vector<16x8xf32>
    tpu.vector_store %arg11[%c0_24, %c0_25], %25 {strides = array<i32>} : memref<16x8xf32, #tpu.memory_space<vmem>>, vector<16x8xf32>,
    return
  }
  func.func @transform_0(%arg0: i32) -> (i32, i32) {
    %c0_i32 = arith.constant 0 : i32
    %c0_i32_0 = arith.constant 0 : i32
    return %arg0, %c0_i32 : i32, i32
  }
  func.func @transform_1(%arg0: i32) -> (i32, i32) {
    %c0_i32 = arith.constant 0 : i32
    %c0_i32_0 = arith.constant 0 : i32
    %c0_i32_1 = arith.constant 0 : i32
    return %c0_i32, %c0_i32_0 : i32, i32
  }
  func.func @transform_2(%arg0: i32) -> (i32, i32) {
    %c0_i32 = arith.constant 0 : i32
    %c0_i32_0 = arith.constant 0 : i32
    %c0_i32_1 = arith.constant 0 : i32
    return %c0_i32, %c0_i32_0 : i32, i32
  }
  func.func @transform_3(%arg0: i32) -> (i32, i32) {
    %c0_i32 = arith.constant 0 : i32
    %c0_i32_0 = arith.constant 0 : i32
    %c0_i32_1 = arith.constant 0 : i32
    return %c0_i32, %c0_i32_0 : i32, i32
  }
  func.func @transform_4(%arg0: i32) -> (i32, i32) {
    %c0_i32 = arith.constant 0 : i32
    %c0_i32_0 = arith.constant 0 : i32
    %c0_i32_1 = arith.constant 0 : i32
    return %c0_i32, %c0_i32_0 : i32, i32
  }
  func.func @transform_5(%arg0: i32) -> (i32, i32) {
    %c0_i32 = arith.constant 0 : i32
    %c0_i32_0 = arith.constant 0 : i32
    %c0_i32_1 = arith.constant 0 : i32
    return %c0_i32, %c0_i32_0 : i32, i32
  }
  func.func @transform_6(%arg0: i32) -> (i32, i32) {
    %c0_i32 = arith.constant 0 : i32
    %c0_i32_0 = arith.constant 0 : i32
    %c0_i32_1 = arith.constant 0 : i32
    return %c0_i32, %c0_i32_0 : i32, i32
  }
  func.func @transform_7(%arg0: i32) -> (i32, i32) {
    %c0_i32 = arith.constant 0 : i32
    %c0_i32_0 = arith.constant 0 : i32
    %c0_i32_1 = arith.constant 0 : i32
    return %c0_i32, %c0_i32_0 : i32, i32
  }
  func.func @transform_8(%arg0: i32) -> (i32, i32) {
    %c0_i32 = arith.constant 0 : i32
    %c0_i32_0 = arith.constant 0 : i32
    %c0_i32_1 = arith.constant 0 : i32
    return %c0_i32, %c0_i32_0 : i32, i32
  }
  func.func @transform_9(%arg0: i32) -> (i32, i32) {
    %c0_i32 = arith.constant 0 : i32
    %c0_i32_0 = arith.constant 0 : i32
    return %arg0, %c0_i32 : i32, i32
  }
  func.func @transform_10(%arg0: i32) -> (i32, i32) {
    %c0_i32 = arith.constant 0 : i32
    %c0_i32_0 = arith.constant 0 : i32
    return %arg0, %c0_i32 : i32, i32
  }
}

</mosaic_0001>

<bundles_post_ra>
// kernel: tpu_custom_call.1
= control target key start
LH: loop header
LB: loop body
LE: loop exit
PB: predicated region body
PF: predicated region fallthrough
CT: control target
= control target key end

     0   :  { %vm43_vm0 = vcmask 130048   ;;  %s388_s0 = inlined_call_operand.vmem [shape: f32[16,16], index: 0, kind: input, shape index: {}]   ;;  %s389_s1 = inlined_call_operand.vmem [shape: f32[16,32], index: 1, kind: input, shape index: {}]   ;;  %s390_s2 = inlined_call_operand.vmem [shape: f32[1,32], index: 2, kind: input, shape index: {}]   ;;  %s391_s3 = inlined_call_operand.vmem [shape: f32[32,32], index: 3, kind: input, shape index: {}]   ;;  %s392_s4 = inlined_call_operand.vmem [shape: f32[1,32], index: 4, kind: input, shape index: {}]   ;;  %s393_s5 = inlined_call_operand.vmem [shape: f32[32,16], index: 5, kind: input, shape index: {}]   ;;  %s394_s6 = inlined_call_operand.vmem [shape: f32[1,16], index: 6, kind: input, shape index: {}]   ;;  %s395_s7 = inlined_call_operand.vmem [shape: f32[32,8], index: 7, kind: input, shape index: {}]   ;;  %s396_s8 = inlined_call_operand.vmem [shape: f32[1,8], index: 8, kind: input, shape index: {}]   ;;  %s397_s9 = inlined_call_operand.hbm [shape: f32[16,16], index: 9, kind: output, shape index: {0}]   ;;  %s398_s10 = inlined_call_operand.vmem [shape: f32[16,8], index: 10, kind: output, shape index: {1}]  }
   0x1   :  { %v38_v0 = vld [vmem:[%s389_s1 + $0x8] sm:$0xff]  ;;  %v37_v1 = vld [vmem:[%s389_s1] sm:$0xff]  ;;  %v78_v3 = vld [vmem:[%s391_s3 + $0x18] sm:$0xff] }
   0x2   :  { %64 = vmatpush.msra.mxu0 %v38_v0  ;;  %v35_v2 = vld [vmem:[%s388_s0] sm:$0xff]  ;;  %102 = vmatpush.msra.mxu1 %v78_v3 }
   0x4   :  { %65 = vmatpush.msra.mxu0 %v37_v1 }
   0x5   :  { %16 = vsyncpa [#allocation3], 0  ;;  %210 = vmatmul.msk.f32.vlgmr.msra.gmra.mxu0 %vm43_vm0, %v35_v2  ;;  %v36_v4 = vld [vmem:[%s388_s0 + $0x8] sm:$0xff]  ;;  %v77_v5 = vld [vmem:[%s391_s3 + $0x10] sm:$0xff]  ;;  %vm83_vm1 = vcmask 261120   ;;  %vm185_vm2 = vcmask 64512  }
   0x6   :  { %103 = vmatpush.msra.mxu1 %v77_v5  ;;  %v76_v6 = vld [vmem:[%s391_s3 + $0x8] sm:$0xff]  ;;  %v75_v7 = vld [vmem:[%s391_s3] sm:$0xff]  ;;  %v118_v8 = vld [vmem:[%s393_s5 + $0x18] sm:$0xff]  ;;  %s251_s27 = smov [#allocation2]   ;;  %s252_s11 = smov 128  }
   0x7   :  { %v123_v9 = vld [vmem:[%s395_s7 + $0x18] sm:$0xff]  ;;  %146 = vmatpush.msra.mxu2 %v118_v8  ;;  %v221_v10 = vld [vmem:[%s390_s2] ss:$0 sm:$0xff]  ;;  %v117_v17 = vld [vmem:[%s393_s5 + $0x10] sm:$0xff]  ;;  %s192_s28 = sshll.u32 %s251_s27, 4  ;;  %s253_s12 = smov 8   ;;  %s193_s28 = int_to_ptr.vmem [resolvable:$true] %s192_s28 }
   0x8   :  { %104 = vmatpush.msra.mxu1 %v76_v6  ;;  %174 = vmatpush.msra.mxu3 %v123_v9  ;;  %v122_v18 = vld [vmem:[%s395_s7 + $0x10] sm:$0xff]  ;;  %v116_v19 = vld [vmem:[%s393_s5 + $0x8] sm:$0xff]  ;;  %v115_v21 = vld [vmem:[%s393_s5] sm:$0xff] }
   0x9   :  { %147 = vmatpush.msra.mxu2 %v117_v17  ;;  %v121_v20 = vld [vmem:[%s395_s7 + $0x8] sm:$0xff]  ;;  %v120_v22 = vld [vmem:[%s395_s7] sm:$0xff] }
   0xa   :  { %105 = vmatpush.msra.mxu1 %v75_v7  ;;  %175 = vmatpush.msra.mxu3 %v122_v18  ;;  %v222_v23 = vld [vmem:[%s392_s4] ss:$0 sm:$0xff] }
   0xb   :  { %148 = vmatpush.msra.mxu2 %v116_v19  ;;  %v223_v30 = vld [vmem:[%s394_s6] ss:$0 sm:$0xff]  ;;  %s194_s6 = sshll.u32 %s397_s9, 4  ;;  %s195_s6 = int_to_ptr.hbm [resolvable:$true] %s194_s6 }
   0xc   :  { %176 = vmatpush.msra.mxu3 %v121_v20  ;;  %v224_v31 = vld [vmem:[%s396_s8] ss:$0 sm:$0xff] }
   0xd   :  { %211 = vmatmul.msk.f32.gmra.mxu0 %vm43_vm0, %v36_v4  ;;  %149 = vmatpush.msra.mxu2 %v115_v21 }
   0xe   :  { %177 = vmatpush.msra.mxu3 %v120_v22 }
  0x82   :  { %v67_v11 = vpop.f32.mrf.mxu0 }
  0x83   :  { %v68_v12 = vadd.f32 %v221_v10, %v67_v11 }
  0x85   :  { %v73_v13 = vmax.f32 %v68_v12, 0.0 }
  0x87   :  { %212 = vmatmul.msk.f32.vlgmr.msra.gmra.mxu1 %vm83_vm1, %v73_v13 }
  0x8a   :  { %v70_v14 = vpop.f32.mrf.mxu0 }
  0x8b   :  { %v71_v15 = vadd.f32 %v221_v10, %v70_v14 }
  0x8d   :  { %v74_v16 = vmax.f32 %v71_v15, 0.0 }
  0x8f   :  { %213 = vmatmul.msk.f32.gmra.mxu1 %vm83_vm1, %v74_v16 }
 0x104   :  { %v107_v24 = vpop.f32.mrf.mxu1 }
 0x105   :  { %v108_v25 = vadd.f32 %v222_v23, %v107_v24 }
 0x107   :  { %v113_v26 = vmax.f32 %v108_v25, 0.0 }
 0x109   :  { %214 = vmatmul.msk.f32.vlgmr.msra.gmra.mxu2 %vm83_vm1, %v113_v26  ;;  %216 = vmatmul.msk.f32.vlgmr.msra.gmra.mxu3 %vm83_vm1, %v113_v26 }
 0x10c   :  { %v110_v27 = vpop.f32.mrf.mxu1 }
 0x10d   :  { %v111_v28 = vadd.f32 %v222_v23, %v110_v27 }
 0x10f   :  { %v114_v29 = vmax.f32 %v111_v28, 0.0 }
 0x111   :  { %215 = vmatmul.msk.f32.gmra.mxu2 %vm83_vm1, %v114_v29  ;;  %217 = vmatmul.msk.f32.gmra.mxu3 %vm83_vm1, %v114_v29 }
 0x18c   :  { %v151_v32 = vpop.f32.mrf.mxu2  ;;  %v179_v33 = vpop.f32.mrf.mxu3 }
 0x18d   :  { %v152_v34 = vadd.f32 %v223_v30, %v151_v32  ;;  %v180_v35 = vadd.f32 %v224_v31, %v179_v33 }
 0x18f   :  { %157 = vst.msk [vmem:[#allocation2] sm:$0xff] %vm43_vm0, %v152_v34 }
 0x190   :  { %186 = vst.msk [vmem:[%s398_s10] sm:$0xff] %vm185_vm2, %v180_v35 }
 0x194   :  { %v154_v36 = vpop.f32.mrf.mxu2  ;;  %v182_v37 = vpop.f32.mrf.mxu3 }
 0x195   :  { %v155_v38 = vadd.f32 %v223_v30, %v154_v36  ;;  %v183_v39 = vadd.f32 %v224_v31, %v182_v37 }
 0x197   :  { %158 = vst.msk [vmem:[#allocation2 + $0x8] sm:$0xff] %vm43_vm0, %v155_v38 }
 0x198   :  { %187 = vst.msk [vmem:[%s398_s10 + $0x8] sm:$0xff] %vm185_vm2, %v183_v39 }
 0x199   :  { %200 = dma.vmem_to_hbm [thread:$0]  %s193_s28, 256, %s195_s6, [#allocation3], %s252_s11, %s252_s11, %s253_s12  }
 0x19a   :  { %249 = dma.done.wait [#allocation3], 256  }
 0x19b   :  { %250 = vsyncadd [#allocation3], 4294967040 }
 0x19c   :  { %209 = vsyncpa [#allocation3], 1 }

</bundles_post_ra>
